<compile_context>
chip_gen: v6e
topology: v6e:2x2x1
jax: 0.10.0
libtpu: 0.0.40
codegen_flags: <defaults>
</compile_context>

<pallas_src>
import functools

import jax
import jax.numpy as jnp
from jax.experimental import pallas as pl
from jax.experimental.pallas import tpu as pltpu

SUBLANES = 8  # TPU sublane granularity; displace channels are padded to this


# ----------------------------- fused Pallas kernel ---------------------------

def _offset_block_kernel(x_ref, w2_ref, b2_ref, chan_ref, valid_ref,
                         wpost_ref, scale_ref, bias_ref, o_ref, *, shifts):
    """Entire OffsetBlock forward for one image, resident in VMEM.

    Channel-major layout: the last dim of every operand is the flat spatial
    index m = y*W + x (lane-dense); channels sit on sublanes.

    x_ref     : (Cin, HW)     f32   input image (plain reshape of NCHW)
    w2_ref    : (2*CDS, Cin)  bf16  merged [pre_offset | attention] weights
    b2_ref    : (2*CDS, 1)    f32   merged biases
    chan_ref  : (G, CDS, 1)   f32   per-group channel-membership column
    valid_ref : (G, 1, HW)    f32   per-group spatial-validity row
    wpost_ref : (Cout, CDS)   bf16  post_offset weights with BN scale folded
    scale_ref : (Cout, 1)     f32   BN scale (residual path)
    bias_ref  : (Cout, 1)     f32   b_post*scale + BN bias, folded
    o_ref     : (Cout, HW)    f32   output image
    """
    hw = x_ref.shape[-1]
    cds = chan_ref.shape[1]

    x_f32 = x_ref[...]
    x_bf = x_f32.astype(jnp.bfloat16)

    # pre_offset + attention 1x1 convs merged into a single MXU push
    # (bf16 in, f32 accumulate); halves split at a sublane-aligned boundary.
    preatt = jnp.dot(w2_ref[...], x_bf,
                     preferred_element_type=jnp.float32) + b2_ref[...]
    pre = preatt[:cds, :]                         # (CDS, HW)
    att = jax.nn.sigmoid(preatt[cds:, :])         # (CDS, HW)

    # Displacement: for flat index m, a channel of group (dy, dx) reads
    # pre[c, m + dy*W + dx] when the shifted pixel is inside the image, else 0.
    # A static lane roll by -(dy*W+dx) brings that value to lane m; the
    # validity row zeroes out-of-image (incl. wrapped-around) lanes and the
    # channel column selects the group's channels.  One XLU roll + two VPU
    # multiplies per group, no scratch, no HBM traffic.
    dis = jnp.zeros_like(pre)
    for g, s in enumerate(shifts):                # <= 9 static (dy, dx) groups
        shifted = pre if s == 0 else pltpu.roll(pre, shift=(-s) % hw, axis=1)
        dis = dis + (shifted * valid_ref[g]) * chan_ref[g]

    # Attention gate, post_offset conv (BN scale pre-folded into the weights),
    # residual add (full-precision x), folded BN bias, ReLU.
    gated = (att * dis).astype(jnp.bfloat16)
    post = jnp.dot(wpost_ref[...], gated, preferred_element_type=jnp.float32)
    out = x_f32 * scale_ref[...] + post + bias_ref[...]
    o_ref[...] = jnp.maximum(out, 0.0)


def _build_fused_call(n, hw, cin, cds, cout, gu, shifts):
    kernel = functools.partial(_offset_block_kernel, shifts=tuple(shifts))
    # Per-image working set (x, out, preatt/pre/att/dis/gated) + invariant
    # operands; x2 for double-buffered activation blocks.  Capped at 48 MiB so
    # the same config is valid on v7x (64 MiB VMEM) as well as v5e/v6e.
    work = 4 * hw * (2 * cin + 2 * cout + 8 * cds) \
        + 4 * (gu * (hw + cds) + 2 * cds * cin + cds * cout + 4 * cout)
    vmem_limit = int(min(max(2 * work, 16 << 20), 48 << 20))
    return pl.pallas_call(
        kernel,
        out_shape=jax.ShapeDtypeStruct((n, cout, hw), jnp.float32),
        grid=(n,),
        in_specs=[
            pl.BlockSpec((None, cin, hw), lambda b: (b, 0, 0)),   # x image
            pl.BlockSpec((2 * cds, cin), lambda b: (0, 0)),       # merged weights
            pl.BlockSpec((2 * cds, 1), lambda b: (0, 0)),         # merged biases
            pl.BlockSpec((gu, cds, 1), lambda b: (0, 0, 0)),      # channel columns
            pl.BlockSpec((gu, 1, hw), lambda b: (0, 0, 0)),       # validity rows
            pl.BlockSpec((cout, cds), lambda b: (0, 0)),          # post weights (BN folded)
            pl.BlockSpec((cout, 1), lambda b: (0, 0)),            # BN scale
            pl.BlockSpec((cout, 1), lambda b: (0, 0)),            # folded bias
        ],
        out_specs=pl.BlockSpec((None, cout, hw), lambda b: (b, 0, 0)),
        compiler_params=pltpu.CompilerParams(
            dimension_semantics=("parallel",),
            vmem_limit_bytes=vmem_limit),
    )


# ------------------------------- module shim ---------------------------------

class OffsetBlockWrapperPallas:
    """JAX/Pallas re-implementation of OffsetBlockWrapper (inference mode)."""
    expansion = 1

    def __init__(self, inplanes, planes, inshape_factor, expand_chan_ratio,
                 height, width, stride=1, downsample=None, key=None):
        assert stride == 1 and downsample is None and inplanes == planes, \
            "synthetic config uses identity residual path"
        self.inplanes = inplanes
        self.planes = planes
        self.height = height
        self.width = width
        cd = int(inplanes * expand_chan_ratio)
        self.empty = (not (expand_chan_ratio > 0)) or cd == 0
        if self.empty:
            # mirrors `self.offset_block = None` -> forward is identity
            return
        self.displace_planes = cd
        H, W = height, width
        hw = H * W

        if key is None:
            key = jax.random.PRNGKey(0)
        k = jax.random.split(key, 6)
        s_in = 1.0 / jnp.sqrt(jnp.float32(inplanes))
        s_cd = 1.0 / jnp.sqrt(jnp.float32(cd))
        # raw parameters (f32, used by the pure-JAX reference) -----------------
        self.w_pre = jax.random.normal(k[0], (inplanes, cd), jnp.float32) * s_in
        self.b_pre = jax.random.normal(k[1], (1, cd), jnp.float32) * 0.01
        self.w_att = jax.random.normal(k[2], (inplanes, cd), jnp.float32) * s_in
        self.b_att = jax.random.normal(k[3], (1, cd), jnp.float32) * 0.01
        self.w_post = jax.random.normal(k[4], (cd, planes), jnp.float32) * s_cd
        self.b_post = jax.random.normal(k[5], (1, planes), jnp.float32) * 0.01
        # BatchNorm2d (inference, fresh stats: gamma=1, beta=0, mean=0, var=1)
        eps = 1e-5
        gamma = jnp.ones((1, planes), jnp.float32)
        beta = jnp.zeros((1, planes), jnp.float32)
        r_mean = jnp.zeros((1, planes), jnp.float32)
        r_var = jnp.ones((1, planes), jnp.float32)
        self.bn_scale = gamma / jnp.sqrt(r_var + eps)
        self.bn_bias = beta - r_mean * self.bn_scale
        # static per-channel integer displacement offsets (dy, dx) in {-1,0,1}
        # TODO(synk): DisplaceChannel uses learnable fractional bilinear offsets;
        # simplified to static integer shifts with zero fill.
        self.offsets = [((c % 3) - 1, ((c // 3) % 3) - 1) for c in range(cd)]

        # ---- fused / folded kernel parameters (channel-major layout) ---------
        cds = max(((cd + SUBLANES - 1) // SUBLANES) * SUBLANES, SUBLANES)
        self._cds = cds
        # merge pre_offset + attention convs into one (2*CDS, Cin) matmul LHS
        w2t = jnp.zeros((2 * cds, inplanes), jnp.float32)
        w2t = w2t.at[:cd, :].set(self.w_pre.T).at[cds:cds + cd, :].set(self.w_att.T)
        b2t = jnp.zeros((2 * cds, 1), jnp.float32)
        b2t = b2t.at[:cd, 0].set(self.b_pre[0]).at[cds:cds + cd, 0].set(self.b_att[0])
        self._w2t = w2t.astype(jnp.bfloat16)
        self._b2t = b2t
        # BN scale folded into post_offset weights; b_post + BN bias folded
        wpost_t = jnp.zeros((planes, cds), jnp.float32)
        wpost_t = wpost_t.at[:, :cd].set((self.w_post * self.bn_scale).T)
        self._wpost_t = wpost_t.astype(jnp.bfloat16)
        self._scale_col = self.bn_scale.T                      # (planes, 1)
        self._bias_col = (self.b_post * self.bn_scale + self.bn_bias).T

        # displacement groups: one static flat shift dy*W + dx per distinct
        # (dy, dx), a (1, HW) validity row and a (CDS, 1) channel column each
        # (the separable factors of the old dense (G, HW, C) mask).
        group_offsets = []
        for off in self.offsets:
            if off not in group_offsets:
                group_offsets.append(off)
        yy = jnp.repeat(jnp.arange(H), W)            # y of flat index m = y*W+x
        xx = jnp.tile(jnp.arange(W), H)              # x of flat index
        valid_rows, chan_cols, shifts = [], [], []
        for (dy, dx) in group_offsets:
            v = ((yy + dy >= 0) & (yy + dy < H) &
                 (xx + dx >= 0) & (xx + dx < W)).astype(jnp.float32)
            valid_rows.append(v.reshape(1, hw))
            chan_cols.append(jnp.asarray(
                [1.0 if (c < cd and self.offsets[c] == (dy, dx)) else 0.0
                 for c in range(cds)], jnp.float32).reshape(cds, 1))
            shifts.append(dy * W + dx)
        self._valid = jnp.stack(valid_rows, axis=0)  # (G, 1, HW)
        self._chan = jnp.stack(chan_cols, axis=0)    # (G, CDS, 1)
        self._shifts = tuple(shifts)
        self._hw = hw
        self._fused_calls = {}
        self._forward = jax.jit(self._forward_impl)

    # ------------------------------------------------------------------ fused
    def _fused_call(self, n):
        if n not in self._fused_calls:
            self._fused_calls[n] = _build_fused_call(
                n, self._hw, self.inplanes, self._cds, self.planes,
                self._chan.shape[0], self._shifts)
        return self._fused_calls[n]

    def _forward_impl(self, x_nchw):
        N, C, H, W = x_nchw.shape
        # channel-major flat layout is a pure reshape of NCHW: no transposes,
        # no extra HBM round trips in the wrapper.
        x_flat = x_nchw.reshape(N, C, H * W)
        out_flat = self._fused_call(N)(
            x_flat, self._w2t, self._b2t, self._chan, self._valid,
            self._wpost_t, self._scale_col, self._bias_col)
        return out_flat.reshape(N, self.planes, H, W)

    def __call__(self, x_nchw):
        if self.empty:
            return x_nchw                            # identity path
        N, C, H, W = x_nchw.shape
        assert C == self.inplanes and H == self.height and W == self.width
        return self._forward(x_nchw)

    # ------------------------------------------------------------- reference
    def reference(self, x_nchw):
        """Pure-JAX reference (same bf16 matmul inputs / f32 residual)."""
        if self.empty:
            return x_nchw
        x = jnp.transpose(x_nchw, (0, 2, 3, 1)).astype(jnp.float32)
        N, H, W, _ = x.shape
        xb = x.astype(jnp.bfloat16)
        pre = jnp.dot(xb, self.w_pre.astype(jnp.bfloat16),
                      preferred_element_type=jnp.float32) + self.b_pre
        att = jax.nn.sigmoid(
            jnp.dot(xb, self.w_att.astype(jnp.bfloat16),
                    preferred_element_type=jnp.float32) + self.b_att)
        padded = jnp.pad(pre, ((0, 0), (1, 1), (1, 1), (0, 0)))
        chans = [padded[:, 1 + dy:1 + dy + H, 1 + dx:1 + dx + W, c]
                 for c, (dy, dx) in enumerate(self.offsets)]
        dis = jnp.stack(chans, axis=-1)
        gated = (att * dis).astype(jnp.bfloat16)
        post = jnp.dot(gated, self.w_post.astype(jnp.bfloat16),
                       preferred_element_type=jnp.float32) + self.b_post
        skip = x + post
        out = jnp.maximum(skip * self.bn_scale + self.bn_bias, 0.0)
        return jnp.transpose(out, (0, 3, 1, 2))


# ----------------------------------- main -------------------------------------

if __name__ == "__main__":
    key = jax.random.PRNGKey(0)
    k_x, k_p = jax.random.split(key)

    N, C, H, W = 2, 16, 16, 16                           # NCHW input
    x = jax.random.normal(k_x, (N, C, H, W), jnp.float32)

    block = OffsetBlockWrapperPallas(
        inplanes=C, planes=C, inshape_factor=4, expand_chan_ratio=0.5,
        height=H, width=W, stride=1, downsample=None, key=k_p)

    y = jax.block_until_ready(block(x))
    assert y.shape == (N, C, H, W), y.shape
    assert bool(jnp.all(jnp.isfinite(y)))
    assert bool(jnp.all(y >= 0.0))                       # post-ReLU

    # numerical check against the pure-JAX reference
    y_ref = jax.block_until_ready(block.reference(x))
    max_err = float(jnp.max(jnp.abs(y - y_ref)))
    assert max_err < 2e-2, f"max |kernel - reference| = {max_err}"

    # empty-wrapper (offset_block is None) path is identity
    empty = OffsetBlockWrapperPallas(
        inplanes=C, planes=C, inshape_factor=4, expand_chan_ratio=0.0,
        height=H, width=W)
    y_id = jax.block_until_ready(empty(x))
    assert jnp.array_equal(y_id, x)

    print("KERNEL_OK")
</pallas_src>

<mosaic_0001>
module attributes {stable_mosaic.version = 11 : i64} {
  func.func @_offset_block_kernel(%arg0: i32, %arg1: memref<1x16x256xf32, #tpu.memory_space<vmem>>, %arg2: memref<16x16xbf16, #tpu.memory_space<vmem>>, %arg3: memref<16x1xf32, #tpu.memory_space<vmem>>, %arg4: memref<8x8x1xf32, #tpu.memory_space<vmem>>, %arg5: memref<8x1x256xf32, #tpu.memory_space<vmem>>, %arg6: memref<16x8xbf16, #tpu.memory_space<vmem>>, %arg7: memref<16x1xf32, #tpu.memory_space<vmem>>, %arg8: memref<16x1xf32, #tpu.memory_space<vmem>>, %arg9: memref<1x16x256xf32, #tpu.memory_space<vmem>>) attributes {dimension_semantics = [#tpu.dimension_semantics<parallel>], iteration_bounds = array<i64: 2>, scalar_prefetch = 0 : i64, scratch_operands = 0 : i64, tpu.core_type = #tpu.core_type<tc>, window_params = [{transform_indices = @transform_0, window_bounds = array<i64: 1, 16, 256>}, {pipeline_mode = #tpu.pipeline_mode<synchronous>, transform_indices = @transform_1, window_bounds = array<i64: 16, 16>}, {pipeline_mode = #tpu.pipeline_mode<synchronous>, transform_indices = @transform_2, window_bounds = array<i64: 16, 1>}, {pipeline_mode = #tpu.pipeline_mode<synchronous>, transform_indices = @transform_3, window_bounds = array<i64: 8, 8, 1>}, {pipeline_mode = #tpu.pipeline_mode<synchronous>, transform_indices = @transform_4, window_bounds = array<i64: 8, 1, 256>}, {pipeline_mode = #tpu.pipeline_mode<synchronous>, transform_indices = @transform_5, window_bounds = array<i64: 16, 8>}, {pipeline_mode = #tpu.pipeline_mode<synchronous>, transform_indices = @transform_6, window_bounds = array<i64: 16, 1>}, {pipeline_mode = #tpu.pipeline_mode<synchronous>, transform_indices = @transform_7, window_bounds = array<i64: 16, 1>}, {transform_indices = @transform_8, window_bounds = array<i64: 1, 16, 256>}]} {
    %c0 = arith.constant 0 : index
    %c0_0 = arith.constant 0 : index
    %c0_1 = arith.constant 0 : index
    %0 = vector.load %arg1[%c0, %c0_0, %c0_1] : memref<1x16x256xf32, #tpu.memory_space<vmem>>, vector<1x16x256xf32>
    %1 = vector.shape_cast %0 : vector<1x16x256xf32> to vector<16x256xf32>
    %2 = arith.truncf %1 : vector<16x256xf32> to vector<16x256xbf16>
    %c0_2 = arith.constant 0 : index
    %c0_3 = arith.constant 0 : index
    %3 = vector.load %arg2[%c0_2, %c0_3] : memref<16x16xbf16, #tpu.memory_space<vmem>>, vector<16x16xbf16>
    %cst = arith.constant dense<0.000000e+00> : vector<16x256xf32>
    %4 = tpu.matmul %3, %2, %cst {dimension_numbers = #tpu.dot_dimension_numbers<[1], [0], [0], [1], [0, 0, 1, 1], [], []>} : vector<16x16xbf16>, vector<16x256xbf16>, vector<16x256xf32> -> vector<16x256xf32>
    %c0_4 = arith.constant 0 : index
    %c0_5 = arith.constant 0 : index
    %5 = vector.load %arg3[%c0_4, %c0_5] : memref<16x1xf32, #tpu.memory_space<vmem>>, vector<16x1xf32>
    %6 = vector.broadcast %5 : vector<16x1xf32> to vector<16x256xf32>
    %7 = arith.addf %4, %6 : vector<16x256xf32>
    %8 = vector.extract_strided_slice %7 {offsets = [0, 0], sizes = [8, 256], strides = [1, 1]} : vector<16x256xf32> to vector<8x256xf32>
    %9 = vector.extract_strided_slice %7 {offsets = [8, 0], sizes = [8, 256], strides = [1, 1]} : vector<16x256xf32> to vector<8x256xf32>
    %10 = arith.negf %9 : vector<8x256xf32>
    %11 = math.exp %10 : vector<8x256xf32>
    %cst_6 = arith.constant 1.000000e+00 : f32
    %12 = vector.broadcast %cst_6 : f32 to vector<8x256xf32>
    %13 = arith.addf %12, %11 : vector<8x256xf32>
    %14 = arith.divf %12, %13 : vector<8x256xf32>
    %cst_7 = arith.constant 0.000000e+00 : f32
    %15 = vector.broadcast %cst_7 : f32 to vector<8x256xf32>
    %c17_i32 = arith.constant 17 : i32
    %16 = tpu.dynamic_rotate %8 by %c17_i32 dim 1 : vector<8x256xf32>, i32 -> vector<8x256xf32>
    %c0_8 = arith.constant 0 : index
    %c0_9 = arith.constant 0 : index
    %c0_10 = arith.constant 0 : index
    %17 = vector.load %arg5[%c0_8, %c0_9, %c0_10] : memref<8x1x256xf32, #tpu.memory_space<vmem>>, vector<1x1x256xf32>
    %18 = vector.shape_cast %17 : vector<1x1x256xf32> to vector<1x256xf32>
    %19 = vector.broadcast %18 : vector<1x256xf32> to vector<8x256xf32>
    %20 = arith.mulf %16, %19 : vector<8x256xf32>
    %c0_11 = arith.constant 0 : index
    %c0_12 = arith.constant 0 : index
    %c0_13 = arith.constant 0 : index
    %21 = vector.load %arg4[%c0_11, %c0_12, %c0_13] : memref<8x8x1xf32, #tpu.memory_space<vmem>>, vector<1x8x1xf32>
    %22 = vector.shape_cast %21 : vector<1x8x1xf32> to vector<8x1xf32>
    %23 = vector.broadcast %22 : vector<8x1xf32> to vector<8x256xf32>
    %24 = arith.mulf %20, %23 : vector<8x256xf32>
    %25 = arith.addf %15, %24 : vector<8x256xf32>
    %c1_i32 = arith.constant 1 : i32
    %26 = tpu.dynamic_rotate %8 by %c1_i32 dim 1 : vector<8x256xf32>, i32 -> vector<8x256xf32>
    %c1 = arith.constant 1 : index
    %c0_14 = arith.constant 0 : index
    %c0_15 = arith.constant 0 : index
    %27 = vector.load %arg5[%c1, %c0_14, %c0_15] : memref<8x1x256xf32, #tpu.memory_space<vmem>>, vector<1x1x256xf32>
    %28 = vector.shape_cast %27 : vector<1x1x256xf32> to vector<1x256xf32>
    %29 = vector.broadcast %28 : vector<1x256xf32> to vector<8x256xf32>
    %30 = arith.mulf %26, %29 : vector<8x256xf32>
    %c1_16 = arith.constant 1 : index
    %c0_17 = arith.constant 0 : index
    %c0_18 = arith.constant 0 : index
    %31 = vector.load %arg4[%c1_16, %c0_17, %c0_18] : memref<8x8x1xf32, #tpu.memory_space<vmem>>, vector<1x8x1xf32>
    %32 = vector.shape_cast %31 : vector<1x8x1xf32> to vector<8x1xf32>
    %33 = vector.broadcast %32 : vector<8x1xf32> to vector<8x256xf32>
    %34 = arith.mulf %30, %33 : vector<8x256xf32>
    %35 = arith.addf %25, %34 : vector<8x256xf32>
    %c241_i32 = arith.constant 241 : i32
    %36 = tpu.dynamic_rotate %8 by %c241_i32 dim 1 : vector<8x256xf32>, i32 -> vector<8x256xf32>
    %c2 = arith.constant 2 : index
    %c0_19 = arith.constant 0 : index
    %c0_20 = arith.constant 0 : index
    %37 = vector.load %arg5[%c2, %c0_19, %c0_20] : memref<8x1x256xf32, #tpu.memory_space<vmem>>, vector<1x1x256xf32>
    %38 = vector.shape_cast %37 : vector<1x1x256xf32> to vector<1x256xf32>
    %39 = vector.broadcast %38 : vector<1x256xf32> to vector<8x256xf32>
    %40 = arith.mulf %36, %39 : vector<8x256xf32>
    %c2_21 = arith.constant 2 : index
    %c0_22 = arith.constant 0 : index
    %c0_23 = arith.constant 0 : index
    %41 = vector.load %arg4[%c2_21, %c0_22, %c0_23] : memref<8x8x1xf32, #tpu.memory_space<vmem>>, vector<1x8x1xf32>
    %42 = vector.shape_cast %41 : vector<1x8x1xf32> to vector<8x1xf32>
    %43 = vector.broadcast %42 : vector<8x1xf32> to vector<8x256xf32>
    %44 = arith.mulf %40, %43 : vector<8x256xf32>
    %45 = arith.addf %35, %44 : vector<8x256xf32>
    %c16_i32 = arith.constant 16 : i32
    %46 = tpu.dynamic_rotate %8 by %c16_i32 dim 1 : vector<8x256xf32>, i32 -> vector<8x256xf32>
    %c3 = arith.constant 3 : index
    %c0_24 = arith.constant 0 : index
    %c0_25 = arith.constant 0 : index
    %47 = vector.load %arg5[%c3, %c0_24, %c0_25] : memref<8x1x256xf32, #tpu.memory_space<vmem>>, vector<1x1x256xf32>
    %48 = vector.shape_cast %47 : vector<1x1x256xf32> to vector<1x256xf32>
    %49 = vector.broadcast %48 : vector<1x256xf32> to vector<8x256xf32>
    %50 = arith.mulf %46, %49 : vector<8x256xf32>
    %c3_26 = arith.constant 3 : index
    %c0_27 = arith.constant 0 : index
    %c0_28 = arith.constant 0 : index
    %51 = vector.load %arg4[%c3_26, %c0_27, %c0_28] : memref<8x8x1xf32, #tpu.memory_space<vmem>>, vector<1x8x1xf32>
    %52 = vector.shape_cast %51 : vector<1x8x1xf32> to vector<8x1xf32>
    %53 = vector.broadcast %52 : vector<8x1xf32> to vector<8x256xf32>
    %54 = arith.mulf %50, %53 : vector<8x256xf32>
    %55 = arith.addf %45, %54 : vector<8x256xf32>
    %c4 = arith.constant 4 : index
    %c0_29 = arith.constant 0 : index
    %c0_30 = arith.constant 0 : index
    %56 = vector.load %arg5[%c4, %c0_29, %c0_30] : memref<8x1x256xf32, #tpu.memory_space<vmem>>, vector<1x1x256xf32>
    %57 = vector.shape_cast %56 : vector<1x1x256xf32> to vector<1x256xf32>
    %58 = vector.broadcast %57 : vector<1x256xf32> to vector<8x256xf32>
    %59 = arith.mulf %8, %58 : vector<8x256xf32>
    %c4_31 = arith.constant 4 : index
    %c0_32 = arith.constant 0 : index
    %c0_33 = arith.constant 0 : index
    %60 = vector.load %arg4[%c4_31, %c0_32, %c0_33] : memref<8x8x1xf32, #tpu.memory_space<vmem>>, vector<1x8x1xf32>
    %61 = vector.shape_cast %60 : vector<1x8x1xf32> to vector<8x1xf32>
    %62 = vector.broadcast %61 : vector<8x1xf32> to vector<8x256xf32>
    %63 = arith.mulf %59, %62 : vector<8x256xf32>
    %64 = arith.addf %55, %63 : vector<8x256xf32>
    %c240_i32 = arith.constant 240 : i32
    %65 = tpu.dynamic_rotate %8 by %c240_i32 dim 1 : vector<8x256xf32>, i32 -> vector<8x256xf32>
    %c5 = arith.constant 5 : index
    %c0_34 = arith.constant 0 : index
    %c0_35 = arith.constant 0 : index
    %66 = vector.load %arg5[%c5, %c0_34, %c0_35] : memref<8x1x256xf32, #tpu.memory_space<vmem>>, vector<1x1x256xf32>
    %67 = vector.shape_cast %66 : vector<1x1x256xf32> to vector<1x256xf32>
    %68 = vector.broadcast %67 : vector<1x256xf32> to vector<8x256xf32>
    %69 = arith.mulf %65, %68 : vector<8x256xf32>
    %c5_36 = arith.constant 5 : index
    %c0_37 = arith.constant 0 : index
    %c0_38 = arith.constant 0 : index
    %70 = vector.load %arg4[%c5_36, %c0_37, %c0_38] : memref<8x8x1xf32, #tpu.memory_space<vmem>>, vector<1x8x1xf32>
    %71 = vector.shape_cast %70 : vector<1x8x1xf32> to vector<8x1xf32>
    %72 = vector.broadcast %71 : vector<8x1xf32> to vector<8x256xf32>
    %73 = arith.mulf %69, %72 : vector<8x256xf32>
    %74 = arith.addf %64, %73 : vector<8x256xf32>
    %c15_i32 = arith.constant 15 : i32
    %75 = tpu.dynamic_rotate %8 by %c15_i32 dim 1 : vector<8x256xf32>, i32 -> vector<8x256xf32>
    %c6 = arith.constant 6 : index
    %c0_39 = arith.constant 0 : index
    %c0_40 = arith.constant 0 : index
    %76 = vector.load %arg5[%c6, %c0_39, %c0_40] : memref<8x1x256xf32, #tpu.memory_space<vmem>>, vector<1x1x256xf32>
    %77 = vector.shape_cast %76 : vector<1x1x256xf32> to vector<1x256xf32>
    %78 = vector.broadcast %77 : vector<1x256xf32> to vector<8x256xf32>
    %79 = arith.mulf %75, %78 : vector<8x256xf32>
    %c6_41 = arith.constant 6 : index
    %c0_42 = arith.constant 0 : index
    %c0_43 = arith.constant 0 : index
    %80 = vector.load %arg4[%c6_41, %c0_42, %c0_43] : memref<8x8x1xf32, #tpu.memory_space<vmem>>, vector<1x8x1xf32>
    %81 = vector.shape_cast %80 : vector<1x8x1xf32> to vector<8x1xf32>
    %82 = vector.broadcast %81 : vector<8x1xf32> to vector<8x256xf32>
    %83 = arith.mulf %79, %82 : vector<8x256xf32>
    %84 = arith.addf %74, %83 : vector<8x256xf32>
    %c255_i32 = arith.constant 255 : i32
    %85 = tpu.dynamic_rotate %8 by %c255_i32 dim 1 : vector<8x256xf32>, i32 -> vector<8x256xf32>
    %c7 = arith.constant 7 : index
    %c0_44 = arith.constant 0 : index
    %c0_45 = arith.constant 0 : index
    %86 = vector.load %arg5[%c7, %c0_44, %c0_45] : memref<8x1x256xf32, #tpu.memory_space<vmem>>, vector<1x1x256xf32>
    %87 = vector.shape_cast %86 : vector<1x1x256xf32> to vector<1x256xf32>
    %88 = vector.broadcast %87 : vector<1x256xf32> to vector<8x256xf32>
    %89 = arith.mulf %85, %88 : vector<8x256xf32>
    %c7_46 = arith.constant 7 : index
    %c0_47 = arith.constant 0 : index
    %c0_48 = arith.constant 0 : index
    %90 = vector.load %arg4[%c7_46, %c0_47, %c0_48] : memref<8x8x1xf32, #tpu.memory_space<vmem>>, vector<1x8x1xf32>
    %91 = vector.shape_cast %90 : vector<1x8x1xf32> to vector<8x1xf32>
    %92 = vector.broadcast %91 : vector<8x1xf32> to vector<8x256xf32>
    %93 = arith.mulf %89, %92 : vector<8x256xf32>
    %94 = arith.addf %84, %93 : vector<8x256xf32>
    %95 = arith.mulf %14, %94 : vector<8x256xf32>
    %96 = arith.truncf %95 : vector<8x256xf32> to vector<8x256xbf16>
    %c0_49 = arith.constant 0 : index
    %c0_50 = arith.constant 0 : index
    %97 = vector.load %arg6[%c0_49, %c0_50] : memref<16x8xbf16, #tpu.memory_space<vmem>>, vector<16x8xbf16>
    %cst_51 = arith.constant dense<0.000000e+00> : vector<16x256xf32>
    %98 = tpu.matmul %97, %96, %cst_51 {dimension_numbers = #tpu.dot_dimension_numbers<[1], [0], [0], [1], [0, 0, 1, 1], [], []>} : vector<16x8xbf16>, vector<8x256xbf16>, vector<16x256xf32> -> vector<16x256xf32>
    %c0_52 = arith.constant 0 : index
    %c0_53 = arith.constant 0 : index
    %99 = vector.load %arg7[%c0_52, %c0_53] : memref<16x1xf32, #tpu.memory_space<vmem>>, vector<16x1xf32>
    %100 = vector.broadcast %99 : vector<16x1xf32> to vector<16x256xf32>
    %101 = arith.mulf %1, %100 : vector<16x256xf32>
    %102 = arith.addf %101, %98 : vector<16x256xf32>
    %c0_54 = arith.constant 0 : index
    %c0_55 = arith.constant 0 : index
    %103 = vector.load %arg8[%c0_54, %c0_55] : memref<16x1xf32, #tpu.memory_space<vmem>>, vector<16x1xf32>
    %104 = vector.broadcast %103 : vector<16x1xf32> to vector<16x256xf32>
    %105 = arith.addf %102, %104 : vector<16x256xf32>
    %cst_56 = arith.constant 0.000000e+00 : f32
    %106 = vector.broadcast %cst_56 : f32 to vector<16x256xf32>
    %107 = arith.maximumf %105, %106 : vector<16x256xf32>
    %c0_57 = arith.constant 0 : index
    %c0_58 = arith.constant 0 : index
    %c0_59 = arith.constant 0 : index
    %108 = vector.load %arg9[%c0_57, %c0_58, %c0_59] : memref<1x16x256xf32, #tpu.memory_space<vmem>>, vector<1x16x256xf32>
    %109 = vector.shape_cast %108 : vector<1x16x256xf32> to vector<16x256xf32>
    %110 = vector.shape_cast %107 : vector<16x256xf32> to vector<1x16x256xf32>
    tpu.vector_store %arg9[%c0_57, %c0_58, %c0_59], %110 {strides = array<i32>} : memref<1x16x256xf32, #tpu.memory_space<vmem>>, vector<1x16x256xf32>,
    return
  }
  func.func @transform_0(%arg0: i32) -> (i32, i32, i32) {
    %c0_i32 = arith.constant 0 : i32
    %c0_i32_0 = arith.constant 0 : i32
    %c0_i32_1 = arith.constant 0 : i32
    return %arg0, %c0_i32, %c0_i32_0 : i32, i32, i32
  }
  func.func @transform_1(%arg0: i32) -> (i32, i32) {
    %c0_i32 = arith.constant 0 : i32
    %c0_i32_0 = arith.constant 0 : i32
    %c0_i32_1 = arith.constant 0 : i32
    return %c0_i32, %c0_i32_0 : i32, i32
  }
  func.func @transform_2(%arg0: i32) -> (i32, i32) {
    %c0_i32 = arith.constant 0 : i32
    %c0_i32_0 = arith.constant 0 : i32
    %c0_i32_1 = arith.constant 0 : i32
    return %c0_i32, %c0_i32_0 : i32, i32
  }
  func.func @transform_3(%arg0: i32) -> (i32, i32, i32) {
    %c0_i32 = arith.constant 0 : i32
    %c0_i32_0 = arith.constant 0 : i32
    %c0_i32_1 = arith.constant 0 : i32
    %c0_i32_2 = arith.constant 0 : i32
    return %c0_i32, %c0_i32_0, %c0_i32_1 : i32, i32, i32
  }
  func.func @transform_4(%arg0: i32) -> (i32, i32, i32) {
    %c0_i32 = arith.constant 0 : i32
    %c0_i32_0 = arith.constant 0 : i32
    %c0_i32_1 = arith.constant 0 : i32
    %c0_i32_2 = arith.constant 0 : i32
    return %c0_i32, %c0_i32_0, %c0_i32_1 : i32, i32, i32
  }
  func.func @transform_5(%arg0: i32) -> (i32, i32) {
    %c0_i32 = arith.constant 0 : i32
    %c0_i32_0 = arith.constant 0 : i32
    %c0_i32_1 = arith.constant 0 : i32
    return %c0_i32, %c0_i32_0 : i32, i32
  }
  func.func @transform_6(%arg0: i32) -> (i32, i32) {
    %c0_i32 = arith.constant 0 : i32
    %c0_i32_0 = arith.constant 0 : i32
    %c0_i32_1 = arith.constant 0 : i32
    return %c0_i32, %c0_i32_0 : i32, i32
  }
  func.func @transform_7(%arg0: i32) -> (i32, i32) {
    %c0_i32 = arith.constant 0 : i32
    %c0_i32_0 = arith.constant 0 : i32
    %c0_i32_1 = arith.constant 0 : i32
    return %c0_i32, %c0_i32_0 : i32, i32
  }
  func.func @transform_8(%arg0: i32) -> (i32, i32, i32) {
    %c0_i32 = arith.constant 0 : i32
    %c0_i32_0 = arith.constant 0 : i32
    %c0_i32_1 = arith.constant 0 : i32
    return %arg0, %c0_i32, %c0_i32_0 : i32, i32, i32
  }
}

</mosaic_0001>

<bundles_post_ra>
// kernel: _forward_impl.1
= control target key start
LH: loop header
LB: loop body
LE: loop exit
PB: predicated region body
PF: predicated region fallthrough
CT: control target
= control target key end

     0   :  { %s935_s27 = smov 0   ;;  %s1148_s0 = inlined_call_operand.vmem [shape: f32[2,16,256], index: 0, kind: input, shape index: {}]   ;;  %s1149_s1 = inlined_call_operand.vmem [shape: bf16[16,16], index: 1, kind: input, shape index: {}]   ;;  %s1150_s2 = inlined_call_operand.vmem [shape: f32[16,1], index: 2, kind: input, shape index: {}]   ;;  %s1151_s3 = inlined_call_operand.vmem [shape: f32[8,8,1], index: 3, kind: input, shape index: {}]   ;;  %s1152_s4 = inlined_call_operand.vmem [shape: f32[8,1,256], index: 4, kind: input, shape index: {}]   ;;  %s1153_s5 = inlined_call_operand.vmem [shape: bf16[16,8], index: 5, kind: input, shape index: {}]   ;;  %s1154_s6 = inlined_call_operand.vmem [shape: f32[16,1], index: 6, kind: input, shape index: {}]   ;;  %s1155_s7 = inlined_call_operand.vmem [shape: f32[16,1], index: 7, kind: input, shape index: {}]   ;;  %s1156_s8 = inlined_call_operand.vmem [shape: f32[2,16,256], index: 8, kind: output, shape index: {}]  }
   0x1 LB: > { %s812_s28 = sadd.s32 4294967295, %s880_s27   ;;  %p816_p0 = scmp.ge.s32.totalorder %s880_s27, 1  ;;  %s880_s27 = sphi %s935_s27, %s18_s27  }
   0x2   : > { %p262_p1 = scmp.lt.s32.totalorder %s880_s27, 3 }
   0x4   : > { %p263_p2 = pnand %p816_p0, %p262_p1 }
   0x5   : > { %p296_p3 = scmp.lt.s32.totalorder (!%p263_p2), %s812_s28, 1  ;;  %s883_s9 = smov (!%p263_p2), 113  }
   0x6   : > { %266 = sbr.rel (%p263_p2) target bundleno = 589 (0x24d), region = 52  ;;  %s884_s10 = smov (!%p263_p2), 17  }
   0x7   : > { %s885_s11 = smov (!%p263_p2), 1   ;;  %s886_s12 = smov (!%p263_p2), 16  }
   0x8   : > { %s887_s14 = smov (!%p263_p2), 15   ;;  %s888_s15 = smov (!%p263_p2), 112  }
   0x9   : > { %s889_s20 = smov (!%p263_p2), 127  }
   0xb   : > { %v882_v0 = vmov 0   ;;  %v315_v1 = vld [vmem:[%s1150_s2] sm:$0xff]  ;;  %s1158_s28 = smov (!%p296_p3, %s812_s28), 1  ;;  %v316_v3 = vld [vmem:[%s1150_s2 + $0x8] sm:$0xff]  ;;  %v828_v10 = vld [vmem:[%s1151_s3 + $0x10] sm:$0xff]  ;;  %vm332_vm0 = vcmask 130048   ;;  %v395_v41 = vlaneseq }
   0xc   : > { %368 = vmatprep.mubr.bf16.mxu0 %v882_v0  ;;  %862 = vset.pattern.permute.xlu0 %v882_v0  ;;  %v414_v2 = vld [vmem:[%s1151_s3] sm:$0xff]  ;;  %s844_s13 = sshll.u32 %s1158_s28, 5  ;;  %v826_v4 = vld [vmem:[%s1151_s3 + $0x8] sm:$0xff]  ;;  %v830_v12 = vld [vmem:[%s1151_s3 + $0x18] sm:$0xff]  ;;  %vm663_vm8 = vcmask 1043456   ;;  %vm659_vm9 = vcmask 64512  }
   0xd   : > { %319 = vperm.xlu0 %862, %v315_v1   ;;  %863 = vset.pattern.permute.xlu1 %v882_v0  ;;  %s300_s18 = scalar_lea.vmem %s1148_s0, %s844_s13  ;;  %v864_v13 = vld [vmem:[%s1149_s1] sm:$0xff]   ;;  %v834_v15 = vld [vmem:[%s1151_s3 + $0x28] sm:$0xff]  ;;  %v838_v21 = vld [vmem:[%s1151_s3 + $0x38] sm:$0xff]  ;;  %v403_v44 = vshrl.u32 %v395_v41, 7  ;;  %v1047_v51 = vand.u32 127, %v395_v41 }
   0xe   : > { %417 = vperm.xlu1 %863, %v414_v2   ;;  %702 = vmatprep.mubr.bf16.mxu1 %v882_v0  ;;  %v963_v5 = vld [vmem:[%s300_s18 + $0x8] sm:$0xff]  ;;  %v965_v6 = vld [vmem:[%s300_s18 + $0x18] sm:$0xff]  ;;  %v967_v7 = vld [vmem:[%s300_s18] sm:$0xff] }
   0xf   : > { %v312_v8 = vpack.c.bf16 %v965_v6, %v963_v5  ;;  %v971_v9 = vld [vmem:[%s300_s18 + $0x10] sm:$0xff]  ;;  %v832_v14 = vld [vmem:[%s1151_s3 + $0x20] sm:$0xff]  ;;  %v714_v23 = vld [vmem:[%s1154_s6 + $0x8] sm:$0xff]  ;;  %v1038_v47 = vsub.s32 0, %v403_v44  ;;  %v1040_v48 = vsub.s32 1, %v403_v44  ;;  %vm428_vm1 = vcmp.lt.s32.totalorder %v1047_v51, 1 }
  0x10   : > { %v311_v11 = vpack.c.bf16 %v971_v9, %v967_v7  ;;  %v836_v22 = vld [vmem:[%s1151_s3 + $0x30] sm:$0xff]  ;;  %v713_v24 = vld [vmem:[%s1154_s6] sm:$0xff]  ;;  %v734_v25 = vld [vmem:[%s1155_s7 + $0x8] sm:$0xff]  ;;  %vm397_vm2 = vcmp.lt.s32.totalorder %v1047_v51, 17  ;;  %vm461_vm3 = vcmp.lt.s32.totalorder %v1047_v51, 113  ;;  %vm494_vm4 = vcmp.lt.s32.totalorder %v1047_v51, 16 }
  0x11   : > { %324 = vperm.xlu0 %862, %v316_v3   ;;  %350 = vmatprep.subr.bf16.mxu0 %v312_v8  ;;  %v733_v26 = vld [vmem:[%s1155_s7] sm:$0xff]  ;;  %v831_v50 = vld [vmem:[%s1152_s4 + $0x8] sm:$0x3]  ;;  %vm553_vm5 = vcmp.lt.s32.totalorder %v1047_v51, 112  ;;  %vm586_vm6 = vcmp.lt.s32.totalorder %v1047_v51, 15  ;;  %vm619_vm7 = vcmp.lt.s32.totalorder %v1047_v51, 127 }
  0x12   : > { %450 = vperm.xlu1 %863, %v826_v4   ;;  %351 = vmatpush1.bf16.msra.mxu0 %v311_v11  ;;  %v825_v53 = vld [vmem:[%s1152_s4 + $0x2] sm:$0x3]  ;;  %v529_v54 = vrot.slane %v831_v50, %v1038_v47  ;;  %v400_v55 = vld [vmem:[%s1152_s4] sm:$0x3]  ;;  %v533_v56 = vrot.slane %v831_v50, %v1040_v48  ;;  %v827_v57 = vld [vmem:[%s1152_s4 + $0x4] sm:$0x3] }
  0x13   : > { %v437_v58 = vrot.slane %v825_v53, %v1038_v47  ;;  %v441_v59 = vrot.slane %v825_v53, %v1040_v48  ;;  %v405_v61 = vrot.slane %v400_v55, %v1038_v47  ;;  %v409_v2 = vrot.slane %v400_v55, %v1040_v48  ;;  %v837_v50 = vld [vmem:[%s1152_s4 + $0xe] sm:$0x3] }
  0x14   : > { %v470_v4 = vrot.slane %v827_v57, %v1038_v47  ;;  %v474_v8 = vrot.slane %v827_v57, %v1040_v48 }
  0x15   : > { %483 = vperm.xlu0 %862, %v828_v10   ;;  %822 = vmatmul.mubr.msk.bf16.vlgmr.msra.gmra.mxu0 %vm332_vm0, %v864_v13 }
  0x16   : > { %516 = vperm.xlu1 %863, %v830_v12  }
  0x19   : > { %542 = vperm.xlu0 %862, %v832_v14  }
  0x1a   : > { %575 = vperm.xlu1 %863, %v834_v15  }
  0x88   : > { %v320_v16 = vpop.permute.xlu0 %319 }
  0x89   : > { %v1026_v27 = vpop.permute.xlu1 %417 }
  0x8c   : > { %v325_v28 = vpop.permute.xlu0 %324 }
  0x8d   : > { %v1028_v29 = vpop.permute.xlu1 %450 }
  0x90   : > { %v1030_v30 = vpop.permute.xlu0 %483 }
  0x91   : > { %v1032_v31 = vpop.permute.xlu1 %516 }
  0x94   : > { %v543_v33 = vpop.permute.xlu0 %542 }
  0x95   : > { %v1034_v35 = vpop.permute.xlu1 %575 }
  0xd5   : > { %v370_v17 = vpop.f32.mrf.mxu0 }
  0xd6   : > { %v990_v18 = vadd.f32 %v370_v17, %v320_v16 }
  0xd7   : > { %v372_v19 = vpop.f32.mrf.mxu0 }
  0xd8   : > { %457 = vrot.lane.b32.xlu1 %v990_v18, %s883_s9  ;;  %391 = vrot.lane.b32.xlu0 %v990_v18, %s884_s10  ;;  %v994_v20 = vadd.f32 %v372_v19, %v320_v16  ;;  %v536_v0 = vmul.f32 %v529_v54, %v990_v18 }
  0xd9   : > { %v374_v32 = vpop.f32.mrf.mxu0 }
  0xda   : > { %v375_v36 = vadd.f32 %v374_v32, %v325_v28  ;;  %v537_v10 = vmul.f32 %v533_v56, %v994_v20 }
  0xdb   : > { %v376_v34 = vpop.f32.mrf.mxu0 }
  0xdc   : > { %393 = vrot.lane.b32.xlu1 %v994_v20, %s884_s10  ;;  %424 = vrot.lane.b32.xlu0 %v990_v18, %s885_s11  ;;  %v377_v38 = vadd.f32 %v376_v34, %v325_v28  ;;  %v823_v40 = vmul.f32 -1.442695, %v375_v36  ;;  %v546_v34 = vmul.f32 %v543_v33, %v537_v10  ;;  %s305_s10 = scalar_lea.vmem %s1156_s8, %s844_s13 }
  0xde   : > { %v824_v43 = vmul.f32 -1.442695, %v377_v38  ;;  %866 = vpow2.f32 %v823_v40 }
  0xe0   : > { %426 = vrot.lane.b32.xlu1 %v994_v20, %s885_s11  ;;  %490 = vrot.lane.b32.xlu0 %v990_v18, %s886_s12  ;;  %868 = vpow2.f32 %v824_v43 }
  0xe4   : > { %582 = vrot.lane.b32.xlu1 %v990_v18, %s887_s14  ;;  %549 = vrot.lane.b32.xlu0 %v990_v18, %s888_s15 }
  0xe8   : > { %641 = vperm.xlu1 %863, %v838_v21   ;;  %459 = vrot.lane.b32.xlu0 %v994_v20, %s883_s9  ;;  %v545_v21 = vmul.f32 %v543_v33, %v536_v0 }
  0xeb   : > { %v867_v1 = vpop.eup %866 }
  0xec   : > { %492 = vrot.lane.b32.xlu1 %v994_v20, %s886_s12  ;;  %608 = vperm.xlu0 %862, %v836_v22   ;;  %v385_v19 = vadd.f32 1.0, %v867_v1 }
  0xed   : > { %v869_v15 = vpop.eup %868 }
  0xee   : > { %v386_v28 = vadd.f32 1.0, %v869_v15  ;;  %870 = vrcp.f32 %v385_v19 }
  0xf0   : > { %551 = vrot.lane.b32.xlu1 %v994_v20, %s888_s15  ;;  %584 = vrot.lane.b32.xlu0 %v994_v20, %s887_s14  ;;  %872 = vrcp.f32 %v386_v28 }
  0xf4   : > { %617 = vrot.lane.b32.xlu1 %v994_v20, %s889_s20  ;;  %615 = vrot.lane.b32.xlu0 %v990_v18, %s889_s20  ;;  %v829_v18 = vld [vmem:[%s1152_s4 + $0x6] sm:$0x3] }
  0xf5   : > { %v503_v32 = vrot.slane %v829_v18, %v1038_v47  ;;  %v507_v38 = vrot.slane %v829_v18, %v1040_v48 }
  0xf8   : > { %722 = vperm.xlu1 %863, %v714_v23   ;;  %717 = vperm.xlu0 %862, %v713_v24  }
  0xfc   : > { %742 = vperm.xlu1 %863, %v734_v25   ;;  %737 = vperm.xlu0 %862, %v733_v26   ;;  %v833_v26 = vld [vmem:[%s1152_s4 + $0xa] sm:$0x3] }
  0xfd   : > { %v562_v40 = vrot.slane %v833_v26, %v1038_v47  ;;  %v566_v41 = vrot.slane %v833_v26, %v1040_v48 }
 0x14a   : > { %v392_v37 = vpop.permute.xlu0 %391  ;;  %v458_v39 = vpop.permute.xlu1 %457 }
 0x14e   : > { %v425_v42 = vpop.permute.xlu0 %424  ;;  %v394_v46 = vpop.permute.xlu1 %393 }
 0x14f   : > { %v398_v11 = vsel %vm397_vm2, %v392_v37, %v394_v46  ;;  %v399_v12 = vsel %vm397_vm2, %v394_v46, %v392_v37 }
 0x150   : > { %v412_v22 = vmul.f32 %v405_v61, %v399_v12  ;;  %v413_v23 = vmul.f32 %v409_v2, %v398_v11 }
 0x152   : > { %v1036_v45 = vpop.permute.xlu0 %490  ;;  %v427_v52 = vpop.permute.xlu1 %426  ;;  %v420_v33 = vmul.f32 %v1026_v27, %v412_v22 }
 0x153   : > { %v429_v62 = vsel %vm428_vm1, %v425_v42, %v427_v52  ;;  %v430_v63 = vsel %vm428_vm1, %v427_v52, %v425_v42  ;;  %v421_v42 = vmul.f32 %v1026_v27, %v413_v23 }
 0x154   : > { %v444_v16 = vmul.f32 %v437_v58, %v430_v63  ;;  %v445_v17 = vmul.f32 %v441_v59, %v429_v62  ;;  %v628_v58 = vrot.slane %v837_v50, %v1038_v47  ;;  %v632_v59 = vrot.slane %v837_v50, %v1040_v48 }
 0x156   : > { %v1042_v49 = vpop.permute.xlu0 %549  ;;  %v583_v3 = vpop.permute.xlu1 %582  ;;  %v453_v36 = vmul.f32 %v1028_v29, %v444_v16  ;;  %v454_v37 = vmul.f32 %v1028_v29, %v445_v17 }
 0x158   : > { %v455_v54 = vadd.f32 %v453_v36, %v420_v33  ;;  %v456_v55 = vadd.f32 %v454_v37, %v421_v42  ;;  %v865_v42 = vld [vmem:[%s1153_s5] sm:$0xff]  }
 0x15a   : > { %v460_v60 = vpop.permute.xlu0 %459 }
 0x15b   : > { %v462_v13 = vsel %vm461_vm3, %v458_v39, %v460_v60  ;;  %v463_v14 = vsel %vm461_vm3, %v460_v60, %v458_v39  ;;  %v835_v39 = vld [vmem:[%s1152_s4 + $0xc] sm:$0x3] }
 0x15c   : > { %v477_v20 = vmul.f32 %v470_v4, %v462_v13  ;;  %v478_v24 = vmul.f32 %v474_v8, %v463_v14  ;;  %v595_v27 = vrot.slane %v835_v39, %v1038_v47  ;;  %v599_v57 = vrot.slane %v835_v39, %v1040_v48 }
 0x15e   : > { %v486_v29 = vmul.f32 %v1030_v30, %v477_v20  ;;  %v487_v43 = vmul.f32 %v1030_v30, %v478_v24 }
 0x160   : > { %v488_v60 = vadd.f32 %v486_v29, %v455_v54  ;;  %v489_v61 = vadd.f32 %v487_v43, %v456_v55 }
 0x163   : > { %v1078_v25 = vpop.permute.xlu1 %641 }
 0x167   : > { %v493_v44 = vpop.permute.xlu1 %492  ;;  %v609_v46 = vpop.permute.xlu0 %608 }
 0x168   : > { %v495_v52 = vsel %vm494_vm4, %v1036_v45, %v493_v44  ;;  %v496_v53 = vsel %vm494_vm4, %v493_v44, %v1036_v45 }
 0x169   : > { %v510_v30 = vmul.f32 %v503_v32, %v496_v53  ;;  %v511_v56 = vmul.f32 %v507_v38, %v495_v52 }
 0x16b   : > { %v519_v62 = vmul.f32 %v1032_v31, %v510_v30  ;;  %v520_v45 = vmul.f32 %v1032_v31, %v511_v56  ;;  %v552_v63 = vpop.permute.xlu1 %551  ;;  %v585_v0 = vpop.permute.xlu0 %584 }
 0x16c   : > { %v554_v1 = vsel %vm553_vm5, %v1042_v49, %v552_v63  ;;  %v555_v2 = vsel %vm553_vm5, %v552_v63, %v1042_v49  ;;  %v587_v47 = vsel %vm586_vm6, %v583_v3, %v585_v0  ;;  %v588_v48 = vsel %vm586_vm6, %v585_v0, %v583_v3 }
 0x16d   : > { %v521_v4 = vadd.f32 %v519_v62, %v488_v60  ;;  %v522_v8 = vadd.f32 %v520_v45, %v489_v61  ;;  %v569_v10 = vmul.f32 %v562_v40, %v554_v1  ;;  %v570_v31 = vmul.f32 %v566_v41, %v555_v2 }
 0x16e   : > { %v602_v11 = vmul.f32 %v595_v27, %v588_v48  ;;  %v603_v12 = vmul.f32 %v599_v57, %v587_v47 }
 0x16f   : > { %v547_v13 = vadd.f32 %v545_v21, %v521_v4  ;;  %v548_v14 = vadd.f32 %v546_v34, %v522_v8  ;;  %v578_v15 = vmul.f32 %v1034_v35, %v569_v10  ;;  %v579_v16 = vmul.f32 %v1034_v35, %v570_v31  ;;  %v618_v17 = vpop.permute.xlu1 %617  ;;  %v616_v49 = vpop.permute.xlu0 %615 }
 0x170   : > { %v611_v18 = vmul.f32 %v609_v46, %v602_v11  ;;  %v612_v19 = vmul.f32 %v609_v46, %v603_v12  ;;  %v620_v22 = vsel %vm619_vm7, %v616_v49, %v618_v17  ;;  %v621_v3 = vsel %vm619_vm7, %v618_v17, %v616_v49  ;;  %v871_v21 = vpop.eup %870 }
 0x171   : > { %v580_v23 = vadd.f32 %v578_v15, %v547_v13  ;;  %v581_v20 = vadd.f32 %v579_v16, %v548_v14  ;;  %v635_v24 = vmul.f32 %v628_v58, %v620_v22  ;;  %v636_v26 = vmul.f32 %v632_v59, %v621_v3  ;;  %v873_v36 = vpop.eup %872 }
 0x173   : > { %v613_v28 = vadd.f32 %v611_v18, %v580_v23  ;;  %v644_v32 = vmul.f32 %v1078_v25, %v635_v24  ;;  %v645_v35 = vmul.f32 %v1078_v25, %v636_v26  ;;  %v614_v34 = vadd.f32 %v612_v19, %v581_v20  ;;  %v718_v25 = vpop.permute.xlu0 %717  ;;  %v723_v43 = vpop.permute.xlu1 %722 }
 0x174   : > { %v725_v29 = vmul.f32 %v718_v25, %v967_v7  ;;  %v726_v46 = vmul.f32 %v718_v25, %v963_v5  ;;  %v727_v27 = vmul.f32 %v723_v43, %v971_v9  ;;  %v728_v56 = vmul.f32 %v723_v43, %v965_v6 }
 0x175   : > { %v647_v37 = vadd.f32 %v645_v35, %v614_v34  ;;  %v646_v38 = vadd.f32 %v644_v32, %v613_v28 }
 0x177   : > { %v649_v39 = vmul.f32 %v873_v36, %v647_v37  ;;  %v648_v40 = vmul.f32 %v871_v21, %v646_v38  ;;  %v738_v52 = vpop.permute.xlu0 %737  ;;  %v743_v59 = vpop.permute.xlu1 %742 }
 0x179   : > { %v651_v41 = vpack.c.bf16 %v649_v39, %v649_v39  ;;  %v650_v51 = vpack.c.bf16 %v648_v40, %v648_v40 }
 0x17b   : > { %840 = vmatprep.subr.msk.bf16.mxu1 %vm663_vm8, %v651_v41  ;;  %v665_v33 = vsel %vm663_vm8, %v650_v51, 0 }
 0x17c   : > { %685 = vmatpush1.bf16.msra.mxu1 %v665_v33 }
 0x17f   : > { %841 = vmatmul.mubr.msk.bf16.vlgmr.msra.gmra.mxu1 %vm659_vm9, %v865_v42 }
 0x23f   : > { %v704_v44 = vpop.f32.mrf.mxu1 }
 0x240   : > { %v729_v50 = vadd.f32 %v725_v29, %v704_v44 }
 0x241   : > { %v706_v53 = vpop.f32.mrf.mxu1 }
 0x242   : > { %v745_v54 = vadd.f32 %v738_v52, %v729_v50  ;;  %v730_v55 = vadd.f32 %v726_v46, %v706_v53 }
 0x243   : > { %v708_v30 = vpop.f32.mrf.mxu1 }
 0x244   : > { %v749_v7 = vmax.f32 %v745_v54, 0.0  ;;  %v746_v57 = vadd.f32 %v738_v52, %v730_v55  ;;  %v731_v58 = vadd.f32 %v727_v27, %v708_v30 }
 0x245   : > { %v710_v5 = vpop.f32.mrf.mxu1 }
 0x246   : > { %753 = vst [vmem:[%s305_s10] sm:$0xff] %v749_v7  ;;  %v750_v60 = vmax.f32 %v746_v57, 0.0  ;;  %v747_v61 = vadd.f32 %v743_v59, %v731_v58  ;;  %v732_v62 = vadd.f32 %v728_v56, %v710_v5 }
 0x248   : > { %754 = vst [vmem:[%s305_s10 + $0x8] sm:$0xff] %v750_v60  ;;  %v751_v9 = vmax.f32 %v747_v61, 0.0  ;;  %v748_v45 = vadd.f32 %v743_v59, %v732_v62 }
 0x24a   : > { %755 = vst [vmem:[%s305_s10 + $0x10] sm:$0xff] %v751_v9  ;;  %v752_v63 = vmax.f32 %v748_v45, 0.0 }
 0x24c   : > { %756 = vst [vmem:[%s305_s10 + $0x18] sm:$0xff] %v752_v63 }
 0x24d PF: > { %s18_s27 = sadd.s32 1, %s880_s27  }
 0x24e   : > { %p15_p4 = scmp.ge.s32.totalorder %s18_s27, 4  }
 0x250   :  { %17 = sbr.rel (!%p15_p4) target bundleno = 1 (0x1), region = 96 }

</bundles_post_ra>
